<compile_context>
chip_gen: v7x
topology: tpu7x:2x2x1
jax: 0.10.0
libtpu: 0.0.40
codegen_flags: <defaults>
</compile_context>

<pallas_src>
import functools

import jax
import jax.numpy as jnp
from jax.experimental import pallas as pl
from jax.experimental.pallas import tpu as pltpu


_NEG_INF = -1e30  # logit bias for padded action lanes -> exp() underflows to 0


def _round_up(x, m):
    return ((x + m - 1) // m) * m


# ---------------------------------------------------------------------------
# Kernel
# ---------------------------------------------------------------------------
def actor_kernel(x_ref, w1_ref, b1_ref, w2_ref, b2_ref, w3_ref, b3_ref, o_ref):
    # fc1 + ReLU (bf16 MXU inputs, f32 accumulation; elementwise stays f32).
    # x arrives as bf16 when the wrapper had to pad (cast folded into the pad),
    # otherwise as f32 and the cast happens here on the VPU.
    x = x_ref[...].astype(jnp.bfloat16)
    h1 = jnp.dot(x, w1_ref[...], preferred_element_type=jnp.float32)
    h1 = jnp.maximum(h1 + b1_ref[...], 0.0)

    # fc2 + ReLU
    h2 = jnp.dot(h1.astype(jnp.bfloat16), w2_ref[...],
                 preferred_element_type=jnp.float32)
    h2 = jnp.maximum(h2 + b2_ref[...], 0.0)

    # fc3 logits, lane-padded to a multiple of 128; padded lanes biased to -1e30
    logits = jnp.dot(h2.astype(jnp.bfloat16), w3_ref[...],
                     preferred_element_type=jnp.float32) + b3_ref[...]

    # Numerically-stable softmax over the (padded) action lanes; padded lanes
    # contribute exactly 0. Exact division -- NOT pl.reciprocal(approx=True),
    # which previously broke the rows-sum-to-1 property.
    m = jnp.max(logits, axis=-1, keepdims=True)
    e = jnp.exp(logits - m)
    denom = jnp.sum(e, axis=-1, keepdims=True)
    o_ref[...] = (e / denom).astype(o_ref.dtype)


# ---------------------------------------------------------------------------
# One-time parameter formatting (hoisted out of the per-call forward)
# ---------------------------------------------------------------------------
def prepare_params(params):
    """Pre-cast weights to bf16 and pad once:
       * fc1 input dim -> multiple of 16 (bf16 sublane packing),
       * action dim    -> full 128-lane slab (lane-dense matmul + unmasked
         output stores); padded b3 lanes get -1e30 so their probs are 0.
    Returns (w1, b1, w2, b2, w3, b3) ready for actor_agent_forward()."""
    w1, b1, w2, b2, w3, b3 = params
    obs, d1 = w1.shape
    d2 = w2.shape[1]
    act = w3.shape[1]
    obs_p = _round_up(obs, 16)
    act_p = _round_up(max(act, 128), 128)

    w1_p = jnp.zeros((obs_p, d1), jnp.bfloat16).at[:obs, :].set(
        w1.astype(jnp.bfloat16))
    w2_p = w2.astype(jnp.bfloat16)
    w3_p = jnp.zeros((w3.shape[0], act_p), jnp.bfloat16).at[:, :act].set(
        w3.astype(jnp.bfloat16))
    b1_p = jnp.asarray(b1, jnp.float32).reshape(1, d1)
    b2_p = jnp.asarray(b2, jnp.float32).reshape(1, d2)
    b3_p = jnp.full((1, act_p), _NEG_INF, jnp.float32).at[:, :act].set(
        jnp.asarray(b3, jnp.float32).reshape(1, act))
    return (w1_p, b1_p, w2_p, b2_p, w3_p, b3_p)


# ---------------------------------------------------------------------------
# Batch-tile selection
# ---------------------------------------------------------------------------
def _choose_tb(batch, block_batch):
    """Batch tile: multiple of 16 (bf16 sublane tile), padded rows kept under
    ~12.5%, and >=2 grid steps once the batch is big enough so the 'parallel'
    batch axis can shard across v7x's two TensorCores."""
    if batch <= 8:
        return 8                                 # single tile == full tiny array
    block_batch = max(16, (int(block_batch) // 16) * 16)
    batch16 = _round_up(batch, 16)
    cap = min(block_batch, batch16)
    if batch16 >= 32:
        cap = min(cap, _round_up((batch16 + 1) // 2, 16))   # >=2 grid steps
    budget = max(16, batch16 // 8)               # <= ~12.5% padded rows
    tb = 16
    for cand in range(cap, 15, -16):             # largest tile within the budget
        if _round_up(batch, cand) - batch <= budget:
            tb = cand
            break
    return tb


# ---------------------------------------------------------------------------
# Forward
# ---------------------------------------------------------------------------
@functools.partial(jax.jit,
                   static_argnames=("act", "tb", "out_dtype", "slice_output"))
def _forward(x, w1, b1, w2, b2, w3, b3, *, act, tb, out_dtype, slice_output):
    batch, obs = x.shape
    obs_p, n1 = w1.shape
    n2 = w2.shape[1]
    act_p = w3.shape[1]
    batch_p = _round_up(batch, tb)

    # Pad x only when the shape is ragged; fold the bf16 cast into the pad so
    # the kernel's x stream (and its double buffer) is half-width. Aligned
    # shapes skip the extra HBM pass and the kernel casts in place.
    if batch_p != batch or obs_p != obs:
        x_in = (jnp.zeros((batch_p, obs_p), jnp.bfloat16)
                .at[:batch, :obs].set(x.astype(jnp.bfloat16)))
    else:
        x_in = x

    grid = (batch_p // tb,)

    def resident(shape):
        # Same block every grid step -> weights/biases stay VMEM-resident.
        return pl.BlockSpec(shape, lambda i: (0, 0))

    out_itemsize = jnp.dtype(out_dtype).itemsize
    flops = 2 * batch_p * (obs_p * n1 + n1 * n2 + n2 * act_p)
    bytes_accessed = (
        x_in.size * x_in.dtype.itemsize
        + (w1.size + w2.size + w3.size) * 2
        + (b1.size + b2.size + b3.size) * 4
        + batch_p * act_p * out_itemsize)

    probs_p = pl.pallas_call(
        actor_kernel,
        out_shape=jax.ShapeDtypeStruct((batch_p, act_p), out_dtype),
        grid=grid,
        in_specs=[
            pl.BlockSpec((tb, obs_p), lambda i: (i, 0)),  # pipelined x tiles
            resident((obs_p, n1)),    # w1
            resident((1, n1)),        # b1
            resident((n1, n2)),       # w2
            resident((1, n2)),        # b2
            resident((n2, act_p)),    # w3 (lane-padded)
            resident((1, act_p)),     # b3 (lane-padded with -1e30)
        ],
        out_specs=pl.BlockSpec((tb, act_p), lambda i: (i, 0)),
        compiler_params=pltpu.CompilerParams(
            dimension_semantics=("parallel",)),
        cost_estimate=pl.CostEstimate(
            flops=flops,
            transcendentals=batch_p * act_p,
            bytes_accessed=bytes_accessed),
    )(x_in, w1, b1, w2, b2, w3, b3)

    if slice_output:
        return probs_p[:batch, :act]
    return probs_p


def actor_agent_forward(x, prepared_params, action_size, *,
                        block_batch=2048, out_dtype=jnp.bfloat16,
                        slice_output=True):
    """ActorAgent forward pass.

    x: (batch, observation_size) f32.
    prepared_params: output of prepare_params() (one-time formatting).
    Returns (batch, action_size) softmax probabilities (bf16 by default; the
    output writeback is the dominant HBM stream, so bf16 halves it; pass
    out_dtype=jnp.float32 for full precision).
    With slice_output=False the padded (batch_p, 128k) block is returned
    (padded action lanes are exactly 0; padded batch rows are the softmax of
    zero inputs) so a downstream sampling kernel can skip the strided slice.
    """
    w1, b1, w2, b2, w3, b3 = prepared_params
    tb = _choose_tb(x.shape[0], block_batch)
    return _forward(x, w1, b1, w2, b2, w3, b3, act=int(action_size), tb=tb,
                    out_dtype=out_dtype, slice_output=slice_output)


# ---------------------------------------------------------------------------
# Init + pure-JAX reference
# ---------------------------------------------------------------------------
def init_params(key, observation_size, action_size):
    """PyTorch nn.Linear default init (uniform +-1/sqrt(fan_in)).
    Weights stored transposed as (in_features, out_features); biases (1, out)."""
    def linear(k, fan_in, fan_out):
        kw, kb = jax.random.split(k)
        bound = 1.0 / jnp.sqrt(fan_in)
        w = jax.random.uniform(kw, (fan_in, fan_out), jnp.float32, -bound, bound)
        b = jax.random.uniform(kb, (1, fan_out), jnp.float32, -bound, bound)
        return w, b

    k1, k2, k3 = jax.random.split(key, 3)
    w1, b1 = linear(k1, observation_size, 128)
    w2, b2 = linear(k2, 128, 256)
    w3, b3 = linear(k3, 256, action_size)
    return (w1, b1, w2, b2, w3, b3)


def reference_forward(x, params):
    """Pure-JAX reference with matching bf16-in / f32-accumulate dots."""
    w1, b1, w2, b2, w3, b3 = params
    bf = jnp.bfloat16
    h1 = jnp.maximum(
        jnp.dot(x.astype(bf), w1.astype(bf),
                preferred_element_type=jnp.float32) + b1, 0.0)
    h2 = jnp.maximum(
        jnp.dot(h1.astype(bf), w2.astype(bf),
                preferred_element_type=jnp.float32) + b2, 0.0)
    logits = jnp.dot(h2.astype(bf), w3.astype(bf),
                     preferred_element_type=jnp.float32) + b3
    return jax.nn.softmax(logits, axis=-1)


if __name__ == "__main__":
    key = jax.random.PRNGKey(0)
    kx, kp = jax.random.split(key)

    batch = 64
    observation_size = 32
    action_size = 4

    x = jax.random.normal(kx, (batch, observation_size), jnp.float32)
    params = init_params(kp, observation_size, action_size)
    prepared = prepare_params(params)   # one-time weight formatting

    probs = actor_agent_forward(x, prepared, action_size)
    probs = jax.block_until_ready(probs)

    ref = reference_forward(x, params)
    p32 = probs.astype(jnp.float32)
    assert probs.shape == (batch, action_size)
    assert bool(jnp.all(p32 >= 0.0)), "negative probability"
    assert bool(jnp.allclose(jnp.sum(p32, axis=-1), 1.0, atol=5e-3)), \
        "rows not normalized"
    assert bool(jnp.allclose(p32, ref, atol=5e-3, rtol=5e-3)), \
        "mismatch vs JAX reference"

    # Ragged batch exercises the pad path (bf16 cast folded into the pad).
    xr = jax.random.normal(kx, (5, observation_size), jnp.float32)
    pr = jax.block_until_ready(actor_agent_forward(xr, prepared, action_size))
    rr = reference_forward(xr, params)
    assert pr.shape == (5, action_size)
    assert bool(jnp.allclose(pr.astype(jnp.float32), rr, atol=5e-3, rtol=5e-3)), \
        "ragged-batch mismatch vs JAX reference"

    print("KERNEL_OK")
</pallas_src>

<mosaic_0001>
module attributes {stable_mosaic.version = 11 : i64} {
  func.func @actor_kernel(%arg0: i32, %arg1: memref<32x32xf32, #tpu.memory_space<vmem>>, %arg2: memref<32x128xbf16, #tpu.memory_space<vmem>>, %arg3: memref<1x128xf32, #tpu.memory_space<vmem>>, %arg4: memref<128x256xbf16, #tpu.memory_space<vmem>>, %arg5: memref<1x256xf32, #tpu.memory_space<vmem>>, %arg6: memref<256x128xbf16, #tpu.memory_space<vmem>>, %arg7: memref<1x128xf32, #tpu.memory_space<vmem>>, %arg8: memref<32x128xbf16, #tpu.memory_space<vmem>>) attributes {dimension_semantics = [#tpu.dimension_semantics<parallel>], iteration_bounds = array<i64: 2>, scalar_prefetch = 0 : i64, scratch_operands = 0 : i64, tpu.core_type = #tpu.core_type<tc>, window_params = [{transform_indices = @transform_0, window_bounds = array<i64: 32, 32>}, {pipeline_mode = #tpu.pipeline_mode<synchronous>, transform_indices = @transform_1, window_bounds = array<i64: 32, 128>}, {pipeline_mode = #tpu.pipeline_mode<synchronous>, transform_indices = @transform_2, window_bounds = array<i64: 1, 128>}, {pipeline_mode = #tpu.pipeline_mode<synchronous>, transform_indices = @transform_3, window_bounds = array<i64: 128, 256>}, {pipeline_mode = #tpu.pipeline_mode<synchronous>, transform_indices = @transform_4, window_bounds = array<i64: 1, 256>}, {pipeline_mode = #tpu.pipeline_mode<synchronous>, transform_indices = @transform_5, window_bounds = array<i64: 256, 128>}, {pipeline_mode = #tpu.pipeline_mode<synchronous>, transform_indices = @transform_6, window_bounds = array<i64: 1, 128>}, {transform_indices = @transform_7, window_bounds = array<i64: 32, 128>}]} {
    %c0 = arith.constant 0 : index
    %c0_0 = arith.constant 0 : index
    %0 = vector.load %arg1[%c0, %c0_0] : memref<32x32xf32, #tpu.memory_space<vmem>>, vector<32x32xf32>
    %1 = arith.truncf %0 : vector<32x32xf32> to vector<32x32xbf16>
    %c0_1 = arith.constant 0 : index
    %c0_2 = arith.constant 0 : index
    %2 = vector.load %arg2[%c0_1, %c0_2] : memref<32x128xbf16, #tpu.memory_space<vmem>>, vector<32x128xbf16>
    %cst = arith.constant dense<0.000000e+00> : vector<32x128xf32>
    %3 = tpu.matmul %1, %2, %cst {dimension_numbers = #tpu.dot_dimension_numbers<[1], [0], [0], [1], [0, 0, 1, 1], [], []>} : vector<32x32xbf16>, vector<32x128xbf16>, vector<32x128xf32> -> vector<32x128xf32>
    %c0_3 = arith.constant 0 : index
    %c0_4 = arith.constant 0 : index
    %4 = vector.load %arg3[%c0_3, %c0_4] : memref<1x128xf32, #tpu.memory_space<vmem>>, vector<1x128xf32>
    %5 = vector.broadcast %4 : vector<1x128xf32> to vector<32x128xf32>
    %6 = arith.addf %3, %5 : vector<32x128xf32>
    %cst_5 = arith.constant 0.000000e+00 : f32
    %7 = vector.broadcast %cst_5 : f32 to vector<32x128xf32>
    %8 = arith.maximumf %6, %7 : vector<32x128xf32>
    %9 = arith.truncf %8 : vector<32x128xf32> to vector<32x128xbf16>
    %c0_6 = arith.constant 0 : index
    %c0_7 = arith.constant 0 : index
    %10 = vector.load %arg4[%c0_6, %c0_7] : memref<128x256xbf16, #tpu.memory_space<vmem>>, vector<128x256xbf16>
    %cst_8 = arith.constant dense<0.000000e+00> : vector<32x256xf32>
    %11 = tpu.matmul %9, %10, %cst_8 {dimension_numbers = #tpu.dot_dimension_numbers<[1], [0], [0], [1], [0, 0, 1, 1], [], []>} : vector<32x128xbf16>, vector<128x256xbf16>, vector<32x256xf32> -> vector<32x256xf32>
    %c0_9 = arith.constant 0 : index
    %c0_10 = arith.constant 0 : index
    %12 = vector.load %arg5[%c0_9, %c0_10] : memref<1x256xf32, #tpu.memory_space<vmem>>, vector<1x256xf32>
    %13 = vector.broadcast %12 : vector<1x256xf32> to vector<32x256xf32>
    %14 = arith.addf %11, %13 : vector<32x256xf32>
    %cst_11 = arith.constant 0.000000e+00 : f32
    %15 = vector.broadcast %cst_11 : f32 to vector<32x256xf32>
    %16 = arith.maximumf %14, %15 : vector<32x256xf32>
    %17 = arith.truncf %16 : vector<32x256xf32> to vector<32x256xbf16>
    %c0_12 = arith.constant 0 : index
    %c0_13 = arith.constant 0 : index
    %18 = vector.load %arg6[%c0_12, %c0_13] : memref<256x128xbf16, #tpu.memory_space<vmem>>, vector<256x128xbf16>
    %cst_14 = arith.constant dense<0.000000e+00> : vector<32x128xf32>
    %19 = tpu.matmul %17, %18, %cst_14 {dimension_numbers = #tpu.dot_dimension_numbers<[1], [0], [0], [1], [0, 0, 1, 1], [], []>} : vector<32x256xbf16>, vector<256x128xbf16>, vector<32x128xf32> -> vector<32x128xf32>
    %c0_15 = arith.constant 0 : index
    %c0_16 = arith.constant 0 : index
    %20 = vector.load %arg7[%c0_15, %c0_16] : memref<1x128xf32, #tpu.memory_space<vmem>>, vector<1x128xf32>
    %21 = vector.broadcast %20 : vector<1x128xf32> to vector<32x128xf32>
    %22 = arith.addf %19, %21 : vector<32x128xf32>
    %cst_17 = arith.constant dense<0xFF800000> : vector<32xf32>
    %23 = vector.multi_reduction <maximumf>, %22, %cst_17 [1] : vector<32x128xf32> to vector<32xf32>
    %24 = vector.shape_cast %23 : vector<32xf32> to vector<32x1xf32>
    %25 = vector.broadcast %24 : vector<32x1xf32> to vector<32x128xf32>
    %26 = arith.subf %22, %25 : vector<32x128xf32>
    %27 = math.exp %26 : vector<32x128xf32>
    %cst_18 = arith.constant dense<0.000000e+00> : vector<32xf32>
    %28 = vector.multi_reduction <add>, %27, %cst_18 [1] : vector<32x128xf32> to vector<32xf32>
    %29 = vector.shape_cast %28 : vector<32xf32> to vector<32x1xf32>
    %30 = vector.broadcast %29 : vector<32x1xf32> to vector<32x128xf32>
    %31 = arith.divf %27, %30 : vector<32x128xf32>
    %32 = arith.truncf %31 : vector<32x128xf32> to vector<32x128xbf16>
    %c0_19 = arith.constant 0 : index
    %c0_20 = arith.constant 0 : index
    %33 = vector.load %arg8[%c0_19, %c0_20] : memref<32x128xbf16, #tpu.memory_space<vmem>>, vector<32x128xbf16>
    tpu.vector_store %arg8[%c0_19, %c0_20], %32 {strides = array<i32>} : memref<32x128xbf16, #tpu.memory_space<vmem>>, vector<32x128xbf16>,
    return
  }
  func.func @transform_0(%arg0: i32) -> (i32, i32) {
    %c0_i32 = arith.constant 0 : i32
    %c0_i32_0 = arith.constant 0 : i32
    return %arg0, %c0_i32 : i32, i32
  }
  func.func @transform_1(%arg0: i32) -> (i32, i32) {
    %c0_i32 = arith.constant 0 : i32
    %c0_i32_0 = arith.constant 0 : i32
    %c0_i32_1 = arith.constant 0 : i32
    return %c0_i32, %c0_i32_0 : i32, i32
  }
  func.func @transform_2(%arg0: i32) -> (i32, i32) {
    %c0_i32 = arith.constant 0 : i32
    %c0_i32_0 = arith.constant 0 : i32
    %c0_i32_1 = arith.constant 0 : i32
    return %c0_i32, %c0_i32_0 : i32, i32
  }
  func.func @transform_3(%arg0: i32) -> (i32, i32) {
    %c0_i32 = arith.constant 0 : i32
    %c0_i32_0 = arith.constant 0 : i32
    %c0_i32_1 = arith.constant 0 : i32
    return %c0_i32, %c0_i32_0 : i32, i32
  }
  func.func @transform_4(%arg0: i32) -> (i32, i32) {
    %c0_i32 = arith.constant 0 : i32
    %c0_i32_0 = arith.constant 0 : i32
    %c0_i32_1 = arith.constant 0 : i32
    return %c0_i32, %c0_i32_0 : i32, i32
  }
  func.func @transform_5(%arg0: i32) -> (i32, i32) {
    %c0_i32 = arith.constant 0 : i32
    %c0_i32_0 = arith.constant 0 : i32
    %c0_i32_1 = arith.constant 0 : i32
    return %c0_i32, %c0_i32_0 : i32, i32
  }
  func.func @transform_6(%arg0: i32) -> (i32, i32) {
    %c0_i32 = arith.constant 0 : i32
    %c0_i32_0 = arith.constant 0 : i32
    %c0_i32_1 = arith.constant 0 : i32
    return %c0_i32, %c0_i32_0 : i32, i32
  }
  func.func @transform_7(%arg0: i32) -> (i32, i32) {
    %c0_i32 = arith.constant 0 : i32
    %c0_i32_0 = arith.constant 0 : i32
    return %arg0, %c0_i32 : i32, i32
  }
}

</mosaic_0001>

<bundles_post_ra>
// kernel: _forward.1
= control target key start
LH: loop header
LB: loop body
LE: loop exit
PB: predicated region body
PF: predicated region fallthrough
CT: control target
= control target key end

     0   :  { %12 = vsyncpa [#allocation3], 0  ;;  %s1335_s0 = inlined_call_operand.vmem [shape: f32[64,32], index: 0, kind: input, shape index: {}]   ;;  %s1336_s1 = inlined_call_operand.vmem [shape: bf16[32,128], index: 1, kind: input, shape index: {}]   ;;  %s1337_s2 = inlined_call_operand.vmem [shape: f32[1,128], index: 2, kind: input, shape index: {}]   ;;  %s1338_s3 = inlined_call_operand.hbm [shape: bf16[128,256], index: 3, kind: input, shape index: {}]   ;;  %s1339_s4 = inlined_call_operand.vmem [shape: f32[1,256], index: 4, kind: input, shape index: {}]   ;;  %s1340_s5 = inlined_call_operand.hbm [shape: bf16[256,128], index: 5, kind: input, shape index: {}]   ;;  %s1341_s6 = inlined_call_operand.vmem [shape: f32[1,128], index: 6, kind: input, shape index: {}]   ;;  %s1342_s7 = inlined_call_operand.vmem [shape: bf16[64,128], index: 7, kind: output, shape index: {}]  }
   0x1   :  { %13 = vsyncpa [#allocation5], 0  ;;  %s1218_s24 = smov 0  }
   0x2 LB: > { %s1171_s25 = smov [#allocation2]   ;;  %s895_s27 = sadd.s32 4294967295, %s1169_s24   ;;  %s1169_s24 = sphi %s1218_s24, %s19_s24  }
   0x3   : > { %s220_s26 = sshll.u32 %s1171_s25, 4  ;;  %p897_p0 = scmp.ge.s32.totalorder %s1169_s24, 1  ;;  %s221_s26 = int_to_ptr.vmem [resolvable:$true] %s220_s26 }
   0x4   : > { %p202_p1 = scmp.lt.s32.totalorder %s1169_s24, 3  ;;  %p1232_p3 = scmp.eq.s32.totalorder %s895_s27, 0 }
   0x5   : > { %s1172_s30 = smov [#allocation4]   ;;  %s1099_s12 = scalar_lea.hbm %s1338_s3, 2048 }
   0x6   : > { %p1226_p2 = pnand %p897_p0, %p202_p1  ;;  %s236_s8 = sshll.u32 %s1172_s30, 4  ;;  %s1244_s8 = int_to_ptr.vmem [resolvable:$true] %s236_s8 }
   0x7   : > { %s1347_s29 = scalar_select %p1232_p3, 1, 0 }
   0x8   : > { %s1346_s28 = scalar_select %p1226_p2, 1, 0 }
   0x9   : > { %p1015_p4 = pneg %p1226_p2  ;;  %p1100_p6 = scmp.ne.s32.totalorder %s1338_s3, %s1099_s12 }
   0xa   : > { %p1106_p10 = scmp.lt.u32.totalorder %s1099_s12, %s1338_s3 }
   0xb   : > { %p1240_p5 = pnand %p1232_p3, %p1015_p4 }
   0xd   : > { %p1101_p7 = pneg %p1240_p5 }
   0xf   : > { %p1102_p8 = pnand %p1101_p7, %p1100_p6 }
  0x11   : > { %p1103_p9 = pneg %p1102_p8 }
  0x13   : > { %p1108_p11 = pnand %p1106_p10, %p1103_p9 }
  0x15   : > { %1111 = shalt.err (!%p1108_p11)
}
  0x16   : > { %s1112_s17 = scalar_lea.vmem %s221_s26, 2048  ;;  %p1120_p1 = scmp.lt.s32.totalorder %s221_s26, %s221_s26 }
  0x17   : > { %p1113_p12 = scmp.ne.s32.totalorder %s221_s26, %s1112_s17  ;;  %p1121_p4 = scmp.lt.s32.totalorder %s1112_s17, %s1112_s17 }
  0x19   : > { %p1115_p13 = pnand %p1113_p12, %p1101_p7  ;;  %p1122_p3 = por %p1121_p4, %p1120_p1 }
  0x1b   : > { %p1116_p0 = pneg %p1115_p13 }
  0x1d   : > { %p1123_p2 = pnand %p1122_p3, %p1116_p0 }
  0x1f   : > { %1126 = shalt.err (!%p1123_p2)
}
  0x20   : > { %s1173_s18 = smov 128   ;;  %s1174_s19 = smov 8  }
  0x21   : > { %1018 = dma.hbm_to_vmem [thread:$0]  (!%p1240_p5), %s1338_s3, 2048, %s221_s26, [#allocation3], %s1173_s18, %s1173_s18, %s1174_s19  }
  0x22   : > { %s1127_s25 = scalar_lea.hbm %s1340_s5, 2048 }
  0x23   : > { %p1128_p6 = scmp.ne.s32.totalorder %s1340_s5, %s1127_s25  ;;  %p1134_p8 = scmp.lt.u32.totalorder %s1127_s25, %s1340_s5 }
  0x25   : > { %p1130_p2 = pnand %p1128_p6, %p1101_p7 }
  0x27   : > { %p1131_p3 = pneg %p1130_p2 }
  0x29   : > { %p1136_p9 = pnand %p1134_p8, %p1131_p3 }
  0x2b   : > { %1139 = shalt.err (!%p1136_p9)
}
  0x2c   : > { %s1140_s26 = scalar_lea.vmem %s1244_s8, 2048  ;;  %p1148_p13 = scmp.lt.s32.totalorder %s1244_s8, %s1244_s8 }
  0x2d   : > { %p1141_p10 = scmp.ne.s32.totalorder %s1244_s8, %s1140_s26  ;;  %p1149_p0 = scmp.lt.s32.totalorder %s1140_s26, %s1140_s26 }
  0x2f   : > { %p1143_p11 = pnand %p1141_p10, %p1101_p7  ;;  %p1150_p1 = por %p1149_p0, %p1148_p13 }
  0x31   : > { %p1144_p12 = pneg %p1143_p11 }
  0x33   : > { %p1151_p4 = pnand %p1150_p1, %p1144_p12 }
  0x35   : > { %1154 = shalt.err (!%p1151_p4)
}
  0x36   : > { %s1175_s13 = smov 64   ;;  %s1176_s14 = smov 4  }
  0x37   : > { %1021 = dma.hbm_to_vmem [thread:$0]  (!%p1240_p5), %s1340_s5, 2048, %s1244_s8, [#allocation5], %s1175_s13, %s1175_s13, %s1176_s14  }
  0x38   : > { %p1349_p6 = scmp.ne.s32.totalorder %s1346_s28, 0 }
  0x39   : > { %p1350_p7 = scmp.ne.s32.totalorder (!%p1349_p6), %s1347_s29, 0 }
  0x3a   : > { %264 = sbr.rel (%p1349_p6) target bundleno = 1065 (0x429), region = 48 }
  0x41   : > { %1160 = dma.done.wait (%p1350_p7), [#allocation3], 2048  }
  0x42   : > { %1162 = vsyncadd (%p1350_p7), [#allocation3], 4294965248 }
  0x43   : > { %1164 = dma.done.wait (%p1350_p7), [#allocation5], 2048  }
  0x44   : > { %1166 = vsyncadd (%p1350_p7), [#allocation5], 4294965248  ;;  %s904_s9 = sshll.u32 %s895_s27, 2  ;;  %v1041_v0 = vld [vmem:[%s1336_s1] sm:$0xff]   ;;  %v1042_v1 = vld [vmem:[%s1336_s1 + $0x8] sm:$0xff]   ;;  %vm342_vm0 = vcmask 261120   ;;  %v422_v56 = vlaneseq }
  0x45   : > { %p301_p2 = scmp.lt.s32.totalorder %s904_s9, 7  ;;  %999 = vmatprep.subr.bf16.mxu0 %v1041_v0  ;;  %v1043_v7 = vld [vmem:[#allocation2 + $0x4] ss:$8 sps:$4 sm:$0xff]   ;;  %v1045_v8 = vld [vmem:[#allocation2] ss:$8 sps:$4 sm:$0xff]   ;;  %v1177_v24 = vmov 0  }
  0x46   : > { %1000 = vmatpush3.bf16.msra.mxu0 %v1041_v0  ;;  %v1046_v9 = vld [vmem:[#allocation2 + $0x14] ss:$8 sps:$4 sm:$0xff]   ;;  %512 = vmatprep.subr.bf16.mxu1 %v1043_v7  ;;  %v1048_v11 = vld [vmem:[#allocation2 + $0x10] ss:$8 sps:$4 sm:$0xff]   ;;  %v1049_v12 = vld [vmem:[#allocation2 + $0x24] ss:$8 sps:$4 sm:$0xff]  }
  0x47   : > { %s1352_s9 = smov (!%p301_p2, %s904_s9), 7  ;;  %1001 = vmatprep.subr.bf16.mxu0 %v1042_v1  ;;  %513 = vmatpush1.bf16.msra.mxu1 %v1045_v8  ;;  %v1051_v13 = vld [vmem:[#allocation2 + $0x20] ss:$8 sps:$4 sm:$0xff]   ;;  %v1052_v14 = vld [vmem:[#allocation2 + $0x34] ss:$8 sps:$4 sm:$0xff]   ;;  %v423_v57 = vshrl.u32 %v422_v56, 7 }
  0x48   : > { %s905_s28 = sshll.u32 %s1352_s9, 3  ;;  %514 = vmatprep.subr.bf16.mxu1 %v1046_v9  ;;  %v1054_v15 = vld [vmem:[#allocation2 + $0x30] ss:$8 sps:$4 sm:$0xff]   ;;  %v1055_v16 = vld [vmem:[#allocation2 + $0x44] ss:$8 sps:$4 sm:$0xff]   ;;  %544 = vmatprep.mubr.bf16.mxu1 %v1177_v24  ;;  %s907_s11 = sshll.u32 %s1352_s9, 2 }
  0x49   : > { %s304_s18 = scalar_lea.vmem %s1335_s0, %s905_s28  ;;  %v1057_v17 = vld [vmem:[#allocation2 + $0x40] ss:$8 sps:$4 sm:$0xff]   ;;  %v1058_v18 = vld [vmem:[#allocation2 + $0x54] ss:$8 sps:$4 sm:$0xff]   ;;  %v1060_v19 = vld [vmem:[#allocation2 + $0x50] ss:$8 sps:$4 sm:$0xff]   ;;  %s310_s13 = scalar_lea.vmem %s1342_s7, %s907_s11 }
  0x4a   : > { %v313_v2 = vld [vmem:[%s304_s18] sm:$0xff]  ;;  %v314_v3 = vld [vmem:[%s304_s18 + $0x8] sm:$0xff]  ;;  %v315_v4 = vld [vmem:[%s304_s18 + $0x10] sm:$0xff]  ;;  %1002 = vmatpush3.bf16.msra.mxu0 %v1042_v1  ;;  %v424_v58 = vsub.s32 0, %v423_v57  ;;  %v428_v60 = vsub.s32 1, %v423_v57 }
  0x4b   : > { %v317_v5 = vpack.c.bf16 %v314_v3, %v313_v2  ;;  %v316_v6 = vld [vmem:[%s304_s18 + $0x18] sm:$0xff]  ;;  %515 = vmatpush1.bf16.msra.mxu1 %v1048_v11  ;;  %v1061_v20 = vld [vmem:[#allocation2 + $0x64] ss:$8 sps:$4 sm:$0xff]   ;;  %v1063_v21 = vld [vmem:[#allocation2 + $0x60] ss:$8 sps:$4 sm:$0xff]  }
  0x4c   : > { %v318_v10 = vpack.c.bf16 %v316_v6, %v315_v4  ;;  %516 = vmatprep.subr.bf16.mxu1 %v1049_v12  ;;  %v1064_v22 = vld [vmem:[#allocation2 + $0x74] ss:$8 sps:$4 sm:$0xff]   ;;  %v1066_v23 = vld [vmem:[#allocation2 + $0x70] ss:$8 sps:$4 sm:$0xff]   ;;  %v1067_v25 = vld [vmem:[#allocation4 + $0x40] sm:$0xff]  }
  0x4d   : > { %1003 = vmatprep.mubr.msk.bf16.mxu0 %vm342_vm0, %v317_v5  ;;  %v1068_v26 = vld [vmem:[#allocation4] sm:$0xff]   ;;  %v1069_v27 = vld [vmem:[#allocation4 + $0x48] sm:$0xff]   ;;  %971 = vmatprep.subr.bf16.mxu0 %v1067_v25  ;;  %v1071_v29 = vld [vmem:[#allocation4 + $0x50] sm:$0xff]  }
  0x4e   : > { %1004 = vmatmul.mubr.msk.bf16.vlgmr.msra.gmra.mrb[0].mxu0 %vm342_vm0, %v318_v10  ;;  %v1070_v28 = vld [vmem:[#allocation4 + $0x8] sm:$0xff]   ;;  %v1072_v30 = vld [vmem:[#allocation4 + $0x10] sm:$0xff]   ;;  %v1073_v31 = vld [vmem:[#allocation4 + $0x58] sm:$0xff]  }
  0x4f   : > { %517 = vmatpush1.bf16.msra.mxu1 %v1051_v13  ;;  %972 = vmatpush3.bf16.msra.mxu0 %v1068_v26  ;;  %v1074_v32 = vld [vmem:[#allocation4 + $0x18] sm:$0xff]   ;;  %v1075_v33 = vld [vmem:[#allocation4 + $0x60] sm:$0xff]   ;;  %v1077_v35 = vld [vmem:[#allocation4 + $0x68] sm:$0xff]  }
  0x50   : > { %518 = vmatprep.subr.bf16.mxu1 %v1052_v14  ;;  %973 = vmatprep.subr.bf16.mxu0 %v1069_v27  ;;  %v1076_v34 = vld [vmem:[#allocation4 + $0x20] sm:$0xff]   ;;  %v1078_v51 = vld [vmem:[#allocation4 + $0x28] sm:$0xff]   ;;  %v1079_v52 = vld [vmem:[#allocation4 + $0x70] sm:$0xff]  }
  0x51   : > { %v908_v36 = vld [vmem:[%s1337_s2] ss:$0 sm:$0xff]  ;;  %v1080_v53 = vld [vmem:[#allocation4 + $0x30] sm:$0xff]   ;;  %v1081_v54 = vld [vmem:[#allocation4 + $0x78] sm:$0xff]  }
  0x52   : > { %v1082_v55 = vld [vmem:[#allocation4 + $0x38] sm:$0xff]   ;;  %v420_v59 = vld [vmem:[%s1339_s4] sm:$0x3] }
  0x53   : > { %519 = vmatpush1.bf16.msra.mxu1 %v1054_v15  ;;  %974 = vmatpush3.bf16.msra.mxu0 %v1070_v28  ;;  %v425_v61 = vrot.slane %v420_v59, %v424_v58  ;;  %v429_v62 = vrot.slane %v420_v59, %v428_v60 }
  0x54   : > { %520 = vmatprep.subr.bf16.mxu1 %v1055_v16  ;;  %975 = vmatprep.subr.bf16.mxu0 %v1071_v29  ;;  %v929_v29 = vld [vmem:[%s1341_s6] ss:$0 sm:$0xff] }
  0x57   : > { %521 = vmatpush1.bf16.msra.mxu1 %v1057_v17  ;;  %976 = vmatpush3.bf16.msra.mxu0 %v1072_v30 }
  0x58   : > { %522 = vmatprep.subr.bf16.mxu1 %v1058_v18  ;;  %977 = vmatprep.subr.bf16.mxu0 %v1073_v31 }
  0x5b   : > { %523 = vmatpush1.bf16.msra.mxu1 %v1060_v19  ;;  %978 = vmatpush3.bf16.msra.mxu0 %v1074_v32 }
  0x5c   : > { %524 = vmatprep.subr.bf16.mxu1 %v1061_v20  ;;  %979 = vmatprep.subr.bf16.mxu0 %v1075_v33 }
  0x5f   : > { %525 = vmatpush1.bf16.msra.mxu1 %v1063_v21  ;;  %980 = vmatpush3.bf16.msra.mxu0 %v1076_v34 }
  0x60   : > { %526 = vmatprep.subr.bf16.mxu1 %v1064_v22  ;;  %981 = vmatprep.subr.bf16.mxu0 %v1077_v35 }
  0x63   : > { %527 = vmatpush1.bf16.msra.mxu1 %v1066_v23  ;;  %982 = vmatpush3.bf16.msra.mxu0 %v1078_v51 }
  0x64   : > { %983 = vmatprep.subr.bf16.mxu0 %v1079_v52 }
  0x67   : > { %984 = vmatpush3.bf16.msra.mxu0 %v1080_v53 }
  0x68   : > { %985 = vmatprep.subr.bf16.mxu0 %v1081_v54 }
  0x6b   : > { %986 = vmatpush3.bf16.msra.mxu0 %v1082_v55 }
 0x121   : > { %v1005_v37 = vpop.f32.mrb[0].mxu0 }
 0x122   : > { %v392_v38 = vadd.f32 %v1005_v37, %v908_v36  ;;  %v383_v39 = vpop.f32.mrb[1].mxu0 }
 0x123   : > { %v384_v40 = vadd.f32 %v908_v36, %v383_v39  ;;  %v1006_v41 = vpop.f32.mrb[2].mxu0 }
 0x124   : > { %v395_v42 = vadd.f32 %v1006_v41, %v908_v36  ;;  %v386_v43 = vpop.f32.mrb[3].mxu0  ;;  %v400_v45 = vmax.f32 %v392_v38, 0.0 }
 0x125   : > { %v387_v44 = vadd.f32 %v908_v36, %v386_v43  ;;  %v398_v47 = vmax.f32 %v384_v40, 0.0 }
 0x126   : > { %v401_v46 = vmax.f32 %v395_v42, 0.0 }
 0x127   : > { %v399_v48 = vmax.f32 %v387_v44, 0.0 }
 0x128   : > { %v403_v49 = vpack.c.bf16 %v401_v46, %v400_v45 }
 0x129   : > { %v402_v50 = vpack.c.bf16 %v399_v48, %v398_v47 }
 0x12b   : > { %545 = vmatmul.mubr.bf16.vlgmr.msra.gmra.mrb[0].mxu1 %v402_v50 }
 0x12c   : > { %554 = vmatprep.mubr.bf16.mxu1 %v1177_v24 }
 0x133   : > { %555 = vmatmul.mubr.bf16.gmra.mrb[4].mxu1 %v403_v49 }
 0x1fe   : > { %v546_v63 = vpop.f32.mrb[0].mxu1 }
 0x1ff   : > { %v547_v0 = vadd.f32 %v546_v63, %v425_v61  ;;  %v548_v1 = vpop.f32.mrb[1].mxu1 }
 0x200   : > { %v549_v2 = vadd.f32 %v548_v1, %v429_v62  ;;  %v550_v3 = vpop.f32.mrb[2].mxu1 }
 0x201   : > { %v551_v4 = vadd.f32 %v550_v3, %v425_v61  ;;  %v552_v5 = vpop.f32.mrb[3].mxu1  ;;  %v565_v7 = vmax.f32 %v547_v0, 0.0 }
 0x202   : > { %v553_v6 = vadd.f32 %v552_v5, %v429_v62  ;;  %v566_v9 = vmax.f32 %v549_v2, 0.0 }
 0x203   : > { %v567_v8 = vmax.f32 %v551_v4, 0.0 }
 0x204   : > { %v568_v10 = vmax.f32 %v553_v6, 0.0 }
 0x205   : > { %v573_v11 = vpack.c.bf16 %v567_v8, %v565_v7 }
 0x206   : > { %v574_v12 = vpack.c.bf16 %v568_v10, %v566_v9  ;;  %v556_v13 = vpop.f32.mrb[4].mxu1 }
 0x207   : > { %v557_v14 = vadd.f32 %v556_v13, %v425_v61  ;;  %v558_v15 = vpop.f32.mrb[5].mxu1 }
 0x208   : > { %v559_v16 = vadd.f32 %v558_v15, %v429_v62  ;;  %v560_v17 = vpop.f32.mrb[6].mxu1  ;;  %744 = vmatprep.mubr.bf16.mxu0 %v574_v12 }
 0x209   : > { %v561_v18 = vadd.f32 %v560_v17, %v425_v61  ;;  %v562_v19 = vpop.f32.mrb[7].mxu1  ;;  %745 = vmatmul.mubr.bf16.vlgmr.msra.gmra.mrb[4].mxu0 %v573_v11  ;;  %v569_v21 = vmax.f32 %v557_v14, 0.0 }
 0x20a   : > { %v563_v20 = vadd.f32 %v562_v19, %v429_v62  ;;  %v570_v23 = vmax.f32 %v559_v16, 0.0 }
 0x20b   : > { %v571_v22 = vmax.f32 %v561_v18, 0.0 }
 0x20c   : > { %v572_v24 = vmax.f32 %v563_v20, 0.0 }
 0x20d   : > { %v575_v25 = vpack.c.bf16 %v571_v22, %v569_v21 }
 0x20e   : > { %v576_v26 = vpack.c.bf16 %v572_v24, %v570_v23 }
 0x210   : > { %752 = vmatprep.mubr.bf16.mxu0 %v576_v26 }
 0x211   : > { %753 = vmatmul.mubr.bf16.gmra.mrb[8].mxu0 %v575_v25 }
 0x2dc   : > { %v987_v27 = vpop.f32.mrb[4].mxu0 }
 0x2dd   : > { %v988_v28 = vpop.f32.mrb[5].mxu0 }
 0x2de   : > { %v989_v30 = vadd.f32 %v988_v28, %v987_v27  ;;  %v990_v31 = vpop.f32.mrb[6].mxu0 }
 0x2df   : > { %v991_v32 = vpop.f32.mrb[7].mxu0 }
 0x2e0   : > { %v992_v33 = vadd.f32 %v991_v32, %v990_v31  ;;  %v747_v34 = vadd.f32 %v989_v30, %v929_v29 }
 0x2e2   : > { %761 = vmax.xlane.f32.xlu0 %v747_v34  ;;  %v750_v36 = vadd.f32 %v992_v33, %v929_v29 }
 0x2e4   : > { %v993_v35 = vpop.f32.mrb[8].mxu0 }
 0x2e5   : > { %v994_v37 = vpop.f32.mrb[9].mxu0 }
 0x2e6   : > { %v995_v38 = vadd.f32 %v994_v37, %v993_v35  ;;  %v996_v39 = vpop.f32.mrb[10].mxu0  ;;  %763 = vmax.xlane.f32.xlu0 %v750_v36 }
 0x2e7   : > { %v997_v40 = vpop.f32.mrb[11].mxu0 }
 0x2e8   : > { %v998_v41 = vadd.f32 %v997_v40, %v996_v39  ;;  %v755_v42 = vadd.f32 %v995_v38, %v929_v29 }
 0x2ea   : > { %765 = vmax.xlane.f32.xlu1 %v755_v42  ;;  %v758_v43 = vadd.f32 %v998_v41, %v929_v29 }
 0x2ee   : > { %767 = vmax.xlane.f32.xlu1 %v758_v43 }
 0x36f   : > { %v762_v44 = vpop.xlane.xlu0 %761 }
 0x370   : > { %v769_v45 = vsub.f32 %v747_v34, %v762_v44 }
 0x372   : > { %v773_v46 = vmul.f32 1.442695, %v769_v45 }
 0x373   : > { %v764_v47 = vpop.xlane.xlu0 %763 }
 0x374   : > { %1083 = vpow2.f32 %v773_v46  ;;  %v770_v48 = vsub.f32 %v750_v36, %v764_v47 }
 0x376   : > { %v775_v49 = vmul.f32 1.442695, %v770_v48 }
 0x377   : > { %v766_v50 = vpop.xlane.xlu1 %765 }
 0x378   : > { %1085 = vpow2.f32 %v775_v49  ;;  %v771_v51 = vsub.f32 %v755_v42, %v766_v50 }
 0x37a   : > { %v777_v52 = vmul.f32 1.442695, %v771_v51 }
 0x37b   : > { %v768_v53 = vpop.xlane.xlu1 %767 }
 0x37c   : > { %1087 = vpow2.f32 %v777_v52  ;;  %v772_v54 = vsub.f32 %v758_v43, %v768_v53 }
 0x37e   : > { %v1084_v55 = vpop.eup %1083  ;;  %v779_v56 = vmul.f32 1.442695, %v772_v54 }
 0x37f   : > { %781 = vadd.xlane.f32.xlu0 %v1084_v55 }
 0x380   : > { %1089 = vpow2.f32 %v779_v56 }
 0x382   : > { %v1086_v57 = vpop.eup %1085 }
 0x383   : > { %783 = vadd.xlane.f32.xlu1 %v1086_v57 }
 0x386   : > { %v1088_v58 = vpop.eup %1087 }
 0x387   : > { %785 = vadd.xlane.f32.xlu0 %v1088_v58 }
 0x38a   : > { %v1090_v59 = vpop.eup %1089 }
 0x38b   : > { %787 = vadd.xlane.f32.xlu1 %v1090_v59 }
 0x40c   : > { %v782_v60 = vpop.xlane.xlu0 %781 }
 0x40d   : > { %1091 = vrcp.f32 %v782_v60 }
 0x410   : > { %v784_v61 = vpop.xlane.xlu1 %783 }
 0x411   : > { %1093 = vrcp.f32 %v784_v61 }
 0x414   : > { %v786_v62 = vpop.xlane.xlu0 %785 }
 0x415   : > { %1095 = vrcp.f32 %v786_v62 }
 0x417   : > { %v1092_v0 = vpop.eup %1091 }
 0x418   : > { %v788_v63 = vpop.xlane.xlu1 %787  ;;  %v790_v2 = vmul.f32 %v1092_v0, %v1084_v55 }
 0x419   : > { %1097 = vrcp.f32 %v788_v63 }
 0x41b   : > { %v1094_v1 = vpop.eup %1093 }
 0x41c   : > { %v792_v3 = vmul.f32 %v1094_v1, %v1086_v57 }
 0x41e   : > { %v959_v4 = vpack.c.bf16 %v792_v3, %v790_v2 }
 0x41f   : > { %v1096_v5 = vpop.eup %1095 }
 0x420   : > { %960 = vst [vmem:[%s310_s13] sm:$0xff] %v959_v4   ;;  %v794_v7 = vmul.f32 %v1096_v5, %v1088_v58 }
 0x423   : > { %v1098_v6 = vpop.eup %1097 }
 0x424   : > { %v796_v8 = vmul.f32 %v1098_v6, %v1090_v59 }
 0x426   : > { %v964_v9 = vpack.c.bf16 %v796_v8, %v794_v7 }
 0x428   : > { %966 = vst [vmem:[%s310_s13 + $0x8] sm:$0xff] %v964_v9  }
 0x429 PF: > { %s19_s24 = sadd.s32 1, %s1169_s24  }
 0x42a   : > { %p16_p5 = scmp.ge.s32.totalorder %s19_s24, 4  }
 0x42c   :  { %18 = sbr.rel (!%p16_p5) target bundleno = 2 (0x2), region = 87 }
 0x433   :  { %839 = vsyncpa [#allocation3], 1 }
 0x434   :  { %841 = vsyncpa [#allocation3 + $0x1], 1 }
 0x435   :  { %842 = vsyncpa [#allocation5], 1 }

</bundles_post_ra>
